<compile_context>
chip_gen: v6e
topology: v6e:2x2x1
jax: 0.10.0
libtpu: 0.0.40
codegen_flags: <defaults>
</compile_context>

<pallas_src>
import functools

import jax
import jax.numpy as jnp
from jax.experimental import pallas as pl
from jax.experimental.pallas import tpu as pltpu

_LANE = 128


def _round_up(n, m):
    return ((n + m - 1) // m) * m


def pgnet_kernel(x_ref, w1_ref, b1_ref, w2_ref, b2_ref, w3_ref, b3_ref, out_ref):
    x = x_ref[...]                      # (TB, D_in) f32 observation tile
    wdt = w1_ref.dtype                  # weight dtype (bf16 by default)

    # fc1 + ReLU  (MXU matmul in weight dtype, f32 accumulate; VPU ops in f32)
    h1 = jnp.dot(x.astype(wdt), w1_ref[...], preferred_element_type=jnp.float32)
    h1 = jnp.maximum(h1 + b1_ref[...], 0.0)

    # fc2 + ReLU
    h2 = jnp.dot(h1.astype(wdt), w2_ref[...], preferred_element_type=jnp.float32)
    h2 = jnp.maximum(h2 + b2_ref[...], 0.0)

    # fc3 (logits, lane-dense padded to 128 columns — no activation)
    out = jnp.dot(h2.astype(wdt), w3_ref[...], preferred_element_type=jnp.float32)
    out_ref[...] = (out + b3_ref[...]).astype(out_ref.dtype)


@functools.partial(jax.jit, static_argnames=("block_batch",))
def pgnet_forward(x, params, *, block_batch=512):
    """x: [batch, input_dims] float32. params: dict of w1,b1,w2,b2,w3,b3.

    Weights are [in_dim, out_dim] (transposed vs. torch.nn.Linear), biases
    are [1, out_dim]. Returns [batch, n_actions] float32 logits.
    """
    batch, d_in = x.shape
    w1, b1 = params["w1"], params["b1"]
    w2, b2 = params["w2"], params["b2"]
    w3, b3 = params["w3"], params["b3"]
    n_actions = w3.shape[1]

    # --- lane-dense logits: pad fc3 output columns to a multiple of 128 ------
    n_pad = _round_up(n_actions, _LANE)
    if n_pad != n_actions:
        w3 = jnp.pad(w3, ((0, 0), (0, n_pad - n_actions)))
        b3 = jnp.pad(b3, ((0, 0), (0, n_pad - n_actions)))

    # --- batch tiling: tile size multiple of 8 (sublane), pad batch to fit ---
    tb = min(block_batch, _round_up(batch, 8))   # block_batch is a multiple of 8
    b_pad = _round_up(batch, tb)
    if b_pad != batch:
        x = jnp.pad(x, ((0, b_pad - batch), (0, 0)))

    # Weights/biases: full-array blocks with a constant index_map -> loaded
    # once, VMEM-resident across all batch tiles.
    resident = lambda a: pl.BlockSpec(a.shape, lambda i: (0,) * a.ndim)

    out = pl.pallas_call(
        pgnet_kernel,
        out_shape=jax.ShapeDtypeStruct((b_pad, n_pad), jnp.float32),
        grid_spec=pl.GridSpec(
            grid=(b_pad // tb,),
            in_specs=[
                pl.BlockSpec((tb, d_in), lambda i: (i, 0)),   # x: streamed per tile
                resident(w1), resident(b1),
                resident(w2), resident(b2),
                resident(w3), resident(b3),
            ],
            out_specs=pl.BlockSpec((tb, n_pad), lambda i: (i, 0)),
        ),
        compiler_params=pltpu.CompilerParams(
            dimension_semantics=("parallel",),   # batch tiles -> both TCs on v7x
        ),
    )(x, w1, b1, w2, b2, w3, b3)

    return out[:batch, :n_actions]


def init_pgnet_params(key, input_dims, fc1_dims, fc2_dims, n_actions,
                      weight_dtype=jnp.bfloat16):
    """PyTorch nn.Linear-style init (U(-1/sqrt(fan_in), 1/sqrt(fan_in))).

    Weights stored in `weight_dtype` (bf16 for MXU-native matmuls); biases f32.
    """
    keys = jax.random.split(key, 6)

    def linear(kw, kb, fan_in, fan_out):
        bound = 1.0 / jnp.sqrt(jnp.float32(fan_in))
        w = jax.random.uniform(kw, (fan_in, fan_out), jnp.float32, -bound, bound)
        b = jax.random.uniform(kb, (1, fan_out), jnp.float32, -bound, bound)
        return w.astype(weight_dtype), b

    w1, b1 = linear(keys[0], keys[1], input_dims, fc1_dims)
    w2, b2 = linear(keys[2], keys[3], fc1_dims, fc2_dims)
    w3, b3 = linear(keys[4], keys[5], fc2_dims, n_actions)
    return {"w1": w1, "b1": b1, "w2": w2, "b2": b2, "w3": w3, "b3": b3}


if __name__ == "__main__":
    # Small shapes consistent with the module's forward; batch=50 with
    # block_batch=32 exercises the multi-tile grid + batch-padding path.
    batch, input_dims, fc1_dims, fc2_dims, n_actions = 50, 16, 32, 32, 4

    key = jax.random.PRNGKey(0)
    k_obs, k_params = jax.random.split(key)

    obs = jax.random.normal(k_obs, (batch, input_dims), jnp.float32)
    params = init_pgnet_params(k_params, input_dims, fc1_dims, fc2_dims, n_actions)

    out = pgnet_forward(obs, params, block_batch=32)
    jax.block_until_ready(out)

    # Reference in plain JAX mirroring the kernel math (bf16 matmuls, f32 acc).
    wdt = params["w1"].dtype
    h = jnp.maximum(
        jnp.dot(obs.astype(wdt), params["w1"], preferred_element_type=jnp.float32)
        + params["b1"], 0.0)
    h = jnp.maximum(
        jnp.dot(h.astype(wdt), params["w2"], preferred_element_type=jnp.float32)
        + params["b2"], 0.0)
    ref = (jnp.dot(h.astype(wdt), params["w3"], preferred_element_type=jnp.float32)
           + params["b3"])

    assert out.shape == (batch, n_actions)
    assert jnp.allclose(out, ref, atol=1e-3, rtol=1e-3), float(jnp.max(jnp.abs(out - ref)))

    print("KERNEL_OK")
</pallas_src>

<mosaic_0001>
module attributes {stable_mosaic.version = 11 : i64} {
  func.func @pgnet_kernel(%arg0: i32, %arg1: memref<32x16xf32, #tpu.memory_space<vmem>>, %arg2: memref<16x32xbf16, #tpu.memory_space<vmem>>, %arg3: memref<1x32xf32, #tpu.memory_space<vmem>>, %arg4: memref<32x32xbf16, #tpu.memory_space<vmem>>, %arg5: memref<1x32xf32, #tpu.memory_space<vmem>>, %arg6: memref<32x128xbf16, #tpu.memory_space<vmem>>, %arg7: memref<1x128xf32, #tpu.memory_space<vmem>>, %arg8: memref<32x128xf32, #tpu.memory_space<vmem>>) attributes {dimension_semantics = [#tpu.dimension_semantics<parallel>], iteration_bounds = array<i64: 2>, scalar_prefetch = 0 : i64, scratch_operands = 0 : i64, tpu.core_type = #tpu.core_type<tc>, window_params = [{transform_indices = @transform_0, window_bounds = array<i64: 32, 16>}, {pipeline_mode = #tpu.pipeline_mode<synchronous>, transform_indices = @transform_1, window_bounds = array<i64: 16, 32>}, {pipeline_mode = #tpu.pipeline_mode<synchronous>, transform_indices = @transform_2, window_bounds = array<i64: 1, 32>}, {pipeline_mode = #tpu.pipeline_mode<synchronous>, transform_indices = @transform_3, window_bounds = array<i64: 32, 32>}, {pipeline_mode = #tpu.pipeline_mode<synchronous>, transform_indices = @transform_4, window_bounds = array<i64: 1, 32>}, {pipeline_mode = #tpu.pipeline_mode<synchronous>, transform_indices = @transform_5, window_bounds = array<i64: 32, 128>}, {pipeline_mode = #tpu.pipeline_mode<synchronous>, transform_indices = @transform_6, window_bounds = array<i64: 1, 128>}, {transform_indices = @transform_7, window_bounds = array<i64: 32, 128>}]} {
    %c0 = arith.constant 0 : index
    %c0_0 = arith.constant 0 : index
    %0 = vector.load %arg1[%c0, %c0_0] : memref<32x16xf32, #tpu.memory_space<vmem>>, vector<32x16xf32>
    %1 = arith.truncf %0 : vector<32x16xf32> to vector<32x16xbf16>
    %c0_1 = arith.constant 0 : index
    %c0_2 = arith.constant 0 : index
    %2 = vector.load %arg2[%c0_1, %c0_2] : memref<16x32xbf16, #tpu.memory_space<vmem>>, vector<16x32xbf16>
    %cst = arith.constant dense<0.000000e+00> : vector<32x32xf32>
    %3 = tpu.matmul %1, %2, %cst {dimension_numbers = #tpu.dot_dimension_numbers<[1], [0], [0], [1], [0, 0, 1, 1], [], []>} : vector<32x16xbf16>, vector<16x32xbf16>, vector<32x32xf32> -> vector<32x32xf32>
    %c0_3 = arith.constant 0 : index
    %c0_4 = arith.constant 0 : index
    %4 = vector.load %arg3[%c0_3, %c0_4] : memref<1x32xf32, #tpu.memory_space<vmem>>, vector<1x32xf32>
    %5 = vector.broadcast %4 : vector<1x32xf32> to vector<32x32xf32>
    %6 = arith.addf %3, %5 : vector<32x32xf32>
    %cst_5 = arith.constant 0.000000e+00 : f32
    %7 = vector.broadcast %cst_5 : f32 to vector<32x32xf32>
    %8 = arith.maximumf %6, %7 : vector<32x32xf32>
    %9 = arith.truncf %8 : vector<32x32xf32> to vector<32x32xbf16>
    %c0_6 = arith.constant 0 : index
    %c0_7 = arith.constant 0 : index
    %10 = vector.load %arg4[%c0_6, %c0_7] : memref<32x32xbf16, #tpu.memory_space<vmem>>, vector<32x32xbf16>
    %cst_8 = arith.constant dense<0.000000e+00> : vector<32x32xf32>
    %11 = tpu.matmul %9, %10, %cst_8 {dimension_numbers = #tpu.dot_dimension_numbers<[1], [0], [0], [1], [0, 0, 1, 1], [], []>} : vector<32x32xbf16>, vector<32x32xbf16>, vector<32x32xf32> -> vector<32x32xf32>
    %c0_9 = arith.constant 0 : index
    %c0_10 = arith.constant 0 : index
    %12 = vector.load %arg5[%c0_9, %c0_10] : memref<1x32xf32, #tpu.memory_space<vmem>>, vector<1x32xf32>
    %13 = vector.broadcast %12 : vector<1x32xf32> to vector<32x32xf32>
    %14 = arith.addf %11, %13 : vector<32x32xf32>
    %cst_11 = arith.constant 0.000000e+00 : f32
    %15 = vector.broadcast %cst_11 : f32 to vector<32x32xf32>
    %16 = arith.maximumf %14, %15 : vector<32x32xf32>
    %17 = arith.truncf %16 : vector<32x32xf32> to vector<32x32xbf16>
    %c0_12 = arith.constant 0 : index
    %c0_13 = arith.constant 0 : index
    %18 = vector.load %arg6[%c0_12, %c0_13] : memref<32x128xbf16, #tpu.memory_space<vmem>>, vector<32x128xbf16>
    %cst_14 = arith.constant dense<0.000000e+00> : vector<32x128xf32>
    %19 = tpu.matmul %17, %18, %cst_14 {dimension_numbers = #tpu.dot_dimension_numbers<[1], [0], [0], [1], [0, 0, 1, 1], [], []>} : vector<32x32xbf16>, vector<32x128xbf16>, vector<32x128xf32> -> vector<32x128xf32>
    %c0_15 = arith.constant 0 : index
    %c0_16 = arith.constant 0 : index
    %20 = vector.load %arg7[%c0_15, %c0_16] : memref<1x128xf32, #tpu.memory_space<vmem>>, vector<1x128xf32>
    %21 = vector.broadcast %20 : vector<1x128xf32> to vector<32x128xf32>
    %22 = arith.addf %19, %21 : vector<32x128xf32>
    %c0_17 = arith.constant 0 : index
    %c0_18 = arith.constant 0 : index
    %23 = vector.load %arg8[%c0_17, %c0_18] : memref<32x128xf32, #tpu.memory_space<vmem>>, vector<32x128xf32>
    tpu.vector_store %arg8[%c0_17, %c0_18], %22 {strides = array<i32>} : memref<32x128xf32, #tpu.memory_space<vmem>>, vector<32x128xf32>,
    return
  }
  func.func @transform_0(%arg0: i32) -> (i32, i32) {
    %c0_i32 = arith.constant 0 : i32
    %c0_i32_0 = arith.constant 0 : i32
    return %arg0, %c0_i32 : i32, i32
  }
  func.func @transform_1(%arg0: i32) -> (i32, i32) {
    %c0_i32 = arith.constant 0 : i32
    %c0_i32_0 = arith.constant 0 : i32
    %c0_i32_1 = arith.constant 0 : i32
    return %c0_i32, %c0_i32_0 : i32, i32
  }
  func.func @transform_2(%arg0: i32) -> (i32, i32) {
    %c0_i32 = arith.constant 0 : i32
    %c0_i32_0 = arith.constant 0 : i32
    %c0_i32_1 = arith.constant 0 : i32
    return %c0_i32, %c0_i32_0 : i32, i32
  }
  func.func @transform_3(%arg0: i32) -> (i32, i32) {
    %c0_i32 = arith.constant 0 : i32
    %c0_i32_0 = arith.constant 0 : i32
    %c0_i32_1 = arith.constant 0 : i32
    return %c0_i32, %c0_i32_0 : i32, i32
  }
  func.func @transform_4(%arg0: i32) -> (i32, i32) {
    %c0_i32 = arith.constant 0 : i32
    %c0_i32_0 = arith.constant 0 : i32
    %c0_i32_1 = arith.constant 0 : i32
    return %c0_i32, %c0_i32_0 : i32, i32
  }
  func.func @transform_5(%arg0: i32) -> (i32, i32) {
    %c0_i32 = arith.constant 0 : i32
    %c0_i32_0 = arith.constant 0 : i32
    %c0_i32_1 = arith.constant 0 : i32
    return %c0_i32, %c0_i32_0 : i32, i32
  }
  func.func @transform_6(%arg0: i32) -> (i32, i32) {
    %c0_i32 = arith.constant 0 : i32
    %c0_i32_0 = arith.constant 0 : i32
    %c0_i32_1 = arith.constant 0 : i32
    return %c0_i32, %c0_i32_0 : i32, i32
  }
  func.func @transform_7(%arg0: i32) -> (i32, i32) {
    %c0_i32 = arith.constant 0 : i32
    %c0_i32_0 = arith.constant 0 : i32
    return %arg0, %c0_i32 : i32, i32
  }
}

</mosaic_0001>

<bundles_post_ra>
// kernel: pgnet_forward.1
= control target key start
LH: loop header
LB: loop body
LE: loop exit
PB: predicated region body
PF: predicated region fallthrough
CT: control target
= control target key end

     0   :  { %s708_s24 = smov 0   ;;  %s760_s0 = inlined_call_operand.vmem [shape: f32[64,16], index: 0, kind: input, shape index: {}]   ;;  %s761_s1 = inlined_call_operand.vmem [shape: bf16[16,32], index: 1, kind: input, shape index: {}]   ;;  %s762_s2 = inlined_call_operand.vmem [shape: f32[1,32], index: 2, kind: input, shape index: {}]   ;;  %s763_s3 = inlined_call_operand.vmem [shape: bf16[32,32], index: 3, kind: input, shape index: {}]   ;;  %s764_s4 = inlined_call_operand.vmem [shape: f32[1,32], index: 4, kind: input, shape index: {}]   ;;  %s765_s5 = inlined_call_operand.vmem [shape: bf16[32,128], index: 5, kind: input, shape index: {}]   ;;  %s766_s6 = inlined_call_operand.vmem [shape: f32[1,128], index: 6, kind: input, shape index: {}]   ;;  %s767_s7 = inlined_call_operand.vmem [shape: f32[64,128], index: 7, kind: output, shape index: {}]  }
   0x1 LB: > { %s589_s25 = sadd.s32 4294967295, %s666_s24   ;;  %p593_p0 = scmp.ge.s32.totalorder %s666_s24, 1  ;;  %s666_s24 = sphi %s708_s24, %s17_s24  }
   0x2   : > { %p238_p1 = scmp.lt.s32.totalorder %s666_s24, 3 }
   0x4   : > { %p239_p2 = pnand %p593_p0, %p238_p1 }
   0x5   : > { %s594_s28 = sshll.u32 (!%p239_p2), %s589_s25, 2 }
   0x6   : > { %242 = sbr.rel (%p239_p2) target bundleno = 632 (0x278), region = 48  ;;  %p271_p3 = scmp.lt.s32.totalorder (!%p239_p2), %s594_s28, 7 }
   0xb   : > { %v655_v0 = vld [vmem:[%s761_s1] sm:$0xff]   ;;  %s769_s28 = smov (!%p271_p3, %s594_s28), 7  ;;  %vm304_vm0 = vcmask 130048   ;;  %v656_v7 = vld [vmem:[%s763_s3 + $0x8] sm:$0xff]   ;;  %vm389_vm1 = vcmask 261120  }
   0xc   : > { %625 = vmatprep.subr.bf16.mxu0 %v655_v0  ;;  %s595_s29 = sshll.u32 %s769_s28, 3  ;;  %631 = vmatprep.subr.bf16.mxu1 %v656_v7  ;;  %v657_v8 = vld [vmem:[%s763_s3] sm:$0xff]   ;;  %v658_v24 = vld [vmem:[%s765_s5 + $0x8] sm:$0xff]  }
   0xd   : > { %626 = vmatpush3.bf16.msra.mxu0 %v655_v0  ;;  %s274_s9 = scalar_lea.vmem %s760_s0, %s595_s29  ;;  %632 = vmatpush3.bf16.msra.mxu1 %v656_v7  ;;  %v598_v11 = vld [vmem:[%s762_s2] ss:$0 sm:$0xff]  ;;  %s280_s27 = scalar_lea.vmem %s767_s7, %s595_s29 }
   0xe   : > { %v283_v1 = vld [vmem:[%s274_s9] sm:$0xff]  ;;  %v284_v2 = vld [vmem:[%s274_s9 + $0x8] sm:$0xff]  ;;  %v285_v3 = vld [vmem:[%s274_s9 + $0x10] sm:$0xff]  ;;  %633 = vmatprep.subr.bf16.mxu1 %v657_v8  ;;  %639 = vmatprep.subr.bf16.mxu0 %v658_v24 }
   0xf   : > { %v287_v4 = vpack.c.bf16 %v284_v2, %v283_v1  ;;  %v286_v5 = vld [vmem:[%s274_s9 + $0x18] sm:$0xff]  ;;  %v659_v25 = vld [vmem:[%s765_s5] sm:$0xff]  }
  0x10   : > { %v288_v6 = vpack.c.bf16 %v286_v5, %v285_v3  ;;  %v602_v28 = vld [vmem:[%s764_s4] ss:$0 sm:$0xff] }
  0x11   : > { %627 = vmatprep.mubr.msk.bf16.mxu0 %vm304_vm0, %v287_v4  ;;  %634 = vmatpush3.bf16.msra.mxu1 %v657_v8  ;;  %v607_v42 = vld [vmem:[%s766_s6] ss:$0 sm:$0xff] }
  0x12   : > { %628 = vmatmul.mubr.msk.bf16.vlgmr.msra.gmra.mxu0 %vm304_vm0, %v288_v6 }
  0x13   : > { %640 = vmatpush3.bf16.msra.mxu0 %v658_v24 }
  0x14   : > { %641 = vmatprep.subr.bf16.mxu0 %v659_v25 }
  0x17   : > { %642 = vmatpush3.bf16.msra.mxu0 %v659_v25 }
  0xd2   : > { %v629_v9 = vpop.f32.mrf.mxu0 }
  0xd3   : > { %v354_v15 = vadd.f32 %v629_v9, %v598_v11 }
  0xd4   : > { %v345_v10 = vpop.f32.mrf.mxu0 }
  0xd5   : > { %v346_v13 = vadd.f32 %v598_v11, %v345_v10  ;;  %v362_v21 = vmax.f32 %v354_v15, 0.0 }
  0xd6   : > { %v630_v12 = vpop.f32.mrf.mxu0 }
  0xd7   : > { %v357_v14 = vadd.f32 %v630_v12, %v598_v11  ;;  %v360_v19 = vmax.f32 %v346_v13, 0.0 }
  0xd8   : > { %v348_v16 = vpop.f32.mrf.mxu0 }
  0xd9   : > { %v349_v17 = vadd.f32 %v598_v11, %v348_v16  ;;  %v363_v18 = vmax.f32 %v357_v14, 0.0 }
  0xdb   : > { %v361_v20 = vmax.f32 %v349_v17, 0.0  ;;  %v365_v23 = vpack.c.bf16 %v363_v18, %v362_v21 }
  0xdd   : > { %v364_v22 = vpack.c.bf16 %v361_v20, %v360_v19 }
  0xdf   : > { %635 = vmatprep.mubr.msk.bf16.mxu1 %vm389_vm1, %v364_v22 }
  0xe0   : > { %636 = vmatmul.mubr.msk.bf16.vlgmr.msra.gmra.mxu1 %vm389_vm1, %v365_v23 }
 0x1a0   : > { %v637_v26 = vpop.f32.mrf.mxu1 }
 0x1a1   : > { %v439_v32 = vadd.f32 %v637_v26, %v602_v28 }
 0x1a2   : > { %v430_v27 = vpop.f32.mrf.mxu1 }
 0x1a3   : > { %v431_v30 = vadd.f32 %v602_v28, %v430_v27  ;;  %v447_v38 = vmax.f32 %v439_v32, 0.0 }
 0x1a4   : > { %v638_v29 = vpop.f32.mrf.mxu1 }
 0x1a5   : > { %v442_v31 = vadd.f32 %v638_v29, %v602_v28  ;;  %v445_v36 = vmax.f32 %v431_v30, 0.0 }
 0x1a6   : > { %v433_v33 = vpop.f32.mrf.mxu1 }
 0x1a7   : > { %v434_v34 = vadd.f32 %v602_v28, %v433_v33  ;;  %v448_v35 = vmax.f32 %v442_v31, 0.0 }
 0x1a9   : > { %v446_v37 = vmax.f32 %v434_v34, 0.0  ;;  %v450_v40 = vpack.c.bf16 %v448_v35, %v447_v38 }
 0x1ab   : > { %v449_v39 = vpack.c.bf16 %v446_v37, %v445_v36 }
 0x1ad   : > { %643 = vmatprep.mubr.msk.bf16.mxu0 %vm389_vm1, %v449_v39 }
 0x1ae   : > { %644 = vmatmul.mubr.msk.bf16.vlgmr.msra.gmra.mxu0 %vm389_vm1, %v450_v40 }
 0x26e   : > { %v645_v41 = vpop.f32.mrf.mxu0 }
 0x26f   : > { %v523_v48 = vadd.f32 %v645_v41, %v607_v42 }
 0x270   : > { %v514_v43 = vpop.f32.mrf.mxu0 }
 0x271   : > { %v515_v44 = vadd.f32 %v607_v42, %v514_v43  ;;  %531 = vst [vmem:[%s280_s27 + $0x10] sm:$0xff] %v523_v48 }
 0x272   : > { %v646_v45 = vpop.f32.mrf.mxu0 }
 0x273   : > { %529 = vst [vmem:[%s280_s27] sm:$0xff] %v515_v44  ;;  %v526_v49 = vadd.f32 %v646_v45, %v607_v42 }
 0x274   : > { %v517_v46 = vpop.f32.mrf.mxu0 }
 0x275   : > { %v518_v47 = vadd.f32 %v607_v42, %v517_v46  ;;  %532 = vst [vmem:[%s280_s27 + $0x18] sm:$0xff] %v526_v49 }
 0x277   : > { %530 = vst [vmem:[%s280_s27 + $0x8] sm:$0xff] %v518_v47 }
 0x278 PF: > { %s17_s24 = sadd.s32 1, %s666_s24  }
 0x279   : > { %p14_p4 = scmp.ge.s32.totalorder %s17_s24, 4  }
 0x27b   :  { %16 = sbr.rel (!%p14_p4) target bundleno = 1 (0x1), region = 78 }

</bundles_post_ra>
